<compile_context>
chip_gen: v6e
topology: v6e:2x2x1
jax: 0.10.0
libtpu: 0.0.40
codegen_flags: <defaults>
</compile_context>

<pallas_src>
import math

import jax
import jax.numpy as jnp
from jax import lax
from jax.experimental import pallas as pl
from jax.experimental.pallas import tpu as pltpu


_LN_EPS = 1e-5  # torch.nn.LayerNorm default


def _layernorm_feat0(h, gamma, beta, eps=_LN_EPS):
    """LayerNorm over axis 0 (features) of (features, batch_tile) activations."""
    mu = jnp.mean(h, axis=0, keepdims=True)
    var = jnp.mean((h - mu) * (h - mu), axis=0, keepdims=True)
    return (h - mu) * lax.rsqrt(var + eps) * gamma + beta


def actor_kernel(ma_ref,
                 x_ref,
                 w1_ref, b1_ref, g1_ref, be1_ref,
                 w2_ref, b2_ref, g2_ref, be2_ref,
                 w3_ref, b3_ref, g3_ref, be3_ref,
                 wpT_ref, bp_ref,
                 out_ref):
    # x block is (tb, state_dim): batch-major straight from HBM (no wrapper
    # transpose).  The first dot_general contracts the feature axis of both
    # operands, so intermediate activations are (features, tb): batch on the
    # 128-lane axis (lane-dense).
    x = x_ref[...].astype(jnp.float32)

    # Block 1: Linear -> ReLU -> LayerNorm      h = W1 @ x^T + b1
    h = lax.dot_general(w1_ref[...], x, (((1,), (1,)), ((), ())),
                        preferred_element_type=jnp.float32) + b1_ref[...]
    h = jnp.maximum(h, 0.0)
    h = _layernorm_feat0(h, g1_ref[...], be1_ref[...])

    # Block 2
    h = jnp.dot(w2_ref[...], h, preferred_element_type=jnp.float32) + b2_ref[...]
    h = jnp.maximum(h, 0.0)
    h = _layernorm_feat0(h, g2_ref[...], be2_ref[...])

    # Block 3
    h = jnp.dot(w3_ref[...], h, preferred_element_type=jnp.float32) + b3_ref[...]
    h = jnp.maximum(h, 0.0)
    h = _layernorm_feat0(h, g3_ref[...], be3_ref[...])

    # Power head: Linear -> sigmoid -> * maxaction, produced batch-major
    # (tb, action_dim) so the output block is stored without any transpose.
    logits = lax.dot_general(h, wpT_ref[...], (((0,), (0,)), ((), ())),
                             preferred_element_type=jnp.float32) + bp_ref[...]
    out_ref[...] = (jax.nn.sigmoid(logits) * ma_ref[0, 0]).astype(out_ref.dtype)


def _pick_tile(B, tile_b):
    """Batch tile: lane-aligned (multiple of 128).  Small batches use a single
    full-extent block; batches > 1024 always get >= 2 grid steps so v7x can
    shard the grid across its two TensorCores."""
    tile_b = max(128, (tile_b // 128) * 128)
    if B <= min(tile_b, 1024):
        return B
    half = ((pl.cdiv(B, 2) + 127) // 128) * 128
    return min(tile_b, half)


def actor_forward(state, params, maxaction, *, tile_b=8192):
    """state: (B, state_dim) f32 (bf16 also accepted; math is f32 in-kernel).
    params: flat list in kernel-argument order (see init_actor_params).
    Returns (B, action_dim) f32."""
    B, state_dim = state.shape
    w1 = params[0]
    wpT = params[12]
    net_width = w1.shape[0]
    action_dim = wpT.shape[1]

    tb = _pick_tile(B, tile_b)
    num_tiles = pl.cdiv(B, tb)      # partial tail tile handled by Pallas clipping

    ma = jnp.full((1, 1), maxaction, dtype=jnp.float32)

    x_spec = pl.BlockSpec((tb, state_dim), lambda i: (i, 0))
    out_spec = pl.BlockSpec((tb, action_dim), lambda i: (i, 0))

    def resident(p):  # fetched once, stays in VMEM across all grid steps
        return pl.BlockSpec(p.shape, lambda i: (0, 0))

    in_specs = ([pl.BlockSpec(memory_space=pltpu.MemorySpace.SMEM)]  # maxaction
                + [x_spec]
                + [resident(p) for p in params])

    param_bytes = sum(int(p.size) * p.dtype.itemsize for p in params)
    flops = int(2 * B * (state_dim * net_width
                         + net_width * (net_width // 2)
                         + (net_width // 2) * (net_width // 4)
                         + (net_width // 4) * action_dim))
    bytes_accessed = int(state.size * state.dtype.itemsize
                         + B * action_dim * 4 + param_bytes)
    transcendentals = int(B * (action_dim + 3))   # sigmoid + 3 rsqrt per row

    # Scoped-VMEM estimate: double-buffered x/out blocks + f32 intermediates
    # (2x slack).  Only bump the limit past v5e's 16 MiB scoped default.
    vmem_est = int(tb * (2 * state_dim * state.dtype.itemsize
                         + 2 * action_dim * 4
                         + 8 * (net_width + net_width // 2 + net_width // 4))
                   + param_bytes) + (1 << 20)
    cp_kwargs = dict(dimension_semantics=("parallel",))
    if vmem_est > (16 << 20):
        cp_kwargs["vmem_limit_bytes"] = int(min(vmem_est, 64 << 20))

    return pl.pallas_call(
        actor_kernel,
        out_shape=jax.ShapeDtypeStruct((B, action_dim), jnp.float32),
        grid=(num_tiles,),
        in_specs=in_specs,
        out_specs=out_spec,
        compiler_params=pltpu.CompilerParams(**cp_kwargs),
        cost_estimate=pl.CostEstimate(
            flops=flops,
            transcendentals=transcendentals,
            bytes_accessed=bytes_accessed),
    )(ma, state, *params)


def init_actor_params(key, state_dim, action_dim, net_width):
    """Torch-like init.  Hidden-layer weights are stored (out, in) (PyTorch
    native); biases/LayerNorm params are (dim, 1) columns for the lane-dense
    (features, batch) kernel layout.  The head weight is stored pre-transposed
    (in, action_dim) and its bias (1, action_dim) so the head emits a
    batch-major block."""
    def uniform(k, shape, fan_in):
        bound = 1.0 / math.sqrt(fan_in)
        return jax.random.uniform(k, shape, jnp.float32, -bound, bound)

    def linear(k, fan_in, fan_out):
        kw, kb = jax.random.split(k)
        return uniform(kw, (fan_out, fan_in), fan_in), uniform(kb, (fan_out, 1), fan_in)

    def ln(dim):
        return jnp.ones((dim, 1), jnp.float32), jnp.zeros((dim, 1), jnp.float32)

    nw, nw2, nw4 = net_width, net_width // 2, net_width // 4
    k1, k2, k3, k4 = jax.random.split(key, 4)
    w1, b1 = linear(k1, state_dim, nw);  g1, be1 = ln(nw)
    w2, b2 = linear(k2, nw, nw2);        g2, be2 = ln(nw2)
    w3, b3 = linear(k3, nw2, nw4);       g3, be3 = ln(nw4)
    kw, kb = jax.random.split(k4)
    wpT = uniform(kw, (nw4, action_dim), nw4)      # pre-transposed head weight
    bp = uniform(kb, (1, action_dim), nw4)
    return [w1, b1, g1, be1, w2, b2, g2, be2, w3, b3, g3, be3, wpT, bp]


def actor_forward_ref(state, params, maxaction):
    """Plain-JAX reference (row-major, matches the PyTorch module)."""
    (w1, b1, g1, be1, w2, b2, g2, be2, w3, b3, g3, be3, wpT, bp) = params

    def ln_rows(h, gamma, beta, eps=_LN_EPS):
        mu = jnp.mean(h, axis=-1, keepdims=True)
        var = jnp.mean((h - mu) * (h - mu), axis=-1, keepdims=True)
        return (h - mu) * lax.rsqrt(var + eps) * gamma + beta

    def block(h, w, b, g, be):
        h = jnp.maximum(h @ w.T + b.T, 0.0)
        return ln_rows(h, g.T, be.T)

    h = block(state.astype(jnp.float32), w1, b1, g1, be1)
    h = block(h, w2, b2, g2, be2)
    h = block(h, w3, b3, g3, be3)
    return jax.nn.sigmoid(h @ wpT + bp) * maxaction


if __name__ == "__main__":
    state_dim, action_dim, net_width, maxaction = 16, 4, 32, 2.0

    key = jax.random.PRNGKey(0)
    k_params, k_state1, k_state2 = jax.random.split(key, 3)
    params = init_actor_params(k_params, state_dim, action_dim, net_width)

    # Small single-tile case (block == full batch extent).
    state = jax.random.normal(k_state1, (8, state_dim), jnp.float32)
    power = jax.block_until_ready(actor_forward(state, params, maxaction))
    ref = actor_forward_ref(state, params, maxaction)
    assert power.shape == (8, action_dim)
    assert jnp.allclose(power, ref, atol=1e-5, rtol=1e-5), "mismatch vs reference"
    assert bool(jnp.all((power >= 0.0) & (power <= maxaction)))

    # Multi-tile case: 3 grid steps, last one a partial (clipped) tile.
    state2 = jax.random.normal(k_state2, (300, state_dim), jnp.float32)
    power2 = jax.block_until_ready(
        actor_forward(state2, params, maxaction, tile_b=128))
    ref2 = actor_forward_ref(state2, params, maxaction)
    assert power2.shape == (300, action_dim)
    assert jnp.allclose(power2, ref2, atol=1e-5, rtol=1e-5), "mismatch (gridded)"

    print("KERNEL_OK")
</pallas_src>

<mosaic_0001>
module attributes {stable_mosaic.version = 11 : i64} {
  func.func @actor_kernel(%arg0: i32, %arg1: memref<1x1xf32, #tpu.memory_space<smem>>, %arg2: memref<8x16xf32, #tpu.memory_space<vmem>>, %arg3: memref<32x16xf32, #tpu.memory_space<vmem>>, %arg4: memref<32x1xf32, #tpu.memory_space<vmem>>, %arg5: memref<32x1xf32, #tpu.memory_space<vmem>>, %arg6: memref<32x1xf32, #tpu.memory_space<vmem>>, %arg7: memref<16x32xf32, #tpu.memory_space<vmem>>, %arg8: memref<16x1xf32, #tpu.memory_space<vmem>>, %arg9: memref<16x1xf32, #tpu.memory_space<vmem>>, %arg10: memref<16x1xf32, #tpu.memory_space<vmem>>, %arg11: memref<8x16xf32, #tpu.memory_space<vmem>>, %arg12: memref<8x1xf32, #tpu.memory_space<vmem>>, %arg13: memref<8x1xf32, #tpu.memory_space<vmem>>, %arg14: memref<8x1xf32, #tpu.memory_space<vmem>>, %arg15: memref<8x4xf32, #tpu.memory_space<vmem>>, %arg16: memref<1x4xf32, #tpu.memory_space<vmem>>, %arg17: memref<8x4xf32, #tpu.memory_space<vmem>>) attributes {dimension_semantics = [#tpu.dimension_semantics<parallel>], iteration_bounds = array<i64: 1>, scalar_prefetch = 0 : i64, scratch_operands = 0 : i64, tpu.core_type = #tpu.core_type<tc>, window_params = [{transform_indices = @transform_0, window_bounds = array<i64: 1, 1>}, {transform_indices = @transform_1, window_bounds = array<i64: 8, 16>}, {pipeline_mode = #tpu.pipeline_mode<synchronous>, transform_indices = @transform_2, window_bounds = array<i64: 32, 16>}, {pipeline_mode = #tpu.pipeline_mode<synchronous>, transform_indices = @transform_3, window_bounds = array<i64: 32, 1>}, {pipeline_mode = #tpu.pipeline_mode<synchronous>, transform_indices = @transform_4, window_bounds = array<i64: 32, 1>}, {pipeline_mode = #tpu.pipeline_mode<synchronous>, transform_indices = @transform_5, window_bounds = array<i64: 32, 1>}, {pipeline_mode = #tpu.pipeline_mode<synchronous>, transform_indices = @transform_6, window_bounds = array<i64: 16, 32>}, {pipeline_mode = #tpu.pipeline_mode<synchronous>, transform_indices = @transform_7, window_bounds = array<i64: 16, 1>}, {pipeline_mode = #tpu.pipeline_mode<synchronous>, transform_indices = @transform_8, window_bounds = array<i64: 16, 1>}, {pipeline_mode = #tpu.pipeline_mode<synchronous>, transform_indices = @transform_9, window_bounds = array<i64: 16, 1>}, {pipeline_mode = #tpu.pipeline_mode<synchronous>, transform_indices = @transform_10, window_bounds = array<i64: 8, 16>}, {pipeline_mode = #tpu.pipeline_mode<synchronous>, transform_indices = @transform_11, window_bounds = array<i64: 8, 1>}, {pipeline_mode = #tpu.pipeline_mode<synchronous>, transform_indices = @transform_12, window_bounds = array<i64: 8, 1>}, {pipeline_mode = #tpu.pipeline_mode<synchronous>, transform_indices = @transform_13, window_bounds = array<i64: 8, 1>}, {pipeline_mode = #tpu.pipeline_mode<synchronous>, transform_indices = @transform_14, window_bounds = array<i64: 8, 4>}, {pipeline_mode = #tpu.pipeline_mode<synchronous>, transform_indices = @transform_15, window_bounds = array<i64: 1, 4>}, {transform_indices = @transform_16, window_bounds = array<i64: 8, 4>}]} {
    %c0 = arith.constant 0 : index
    %c0_0 = arith.constant 0 : index
    %0 = vector.load %arg2[%c0, %c0_0] : memref<8x16xf32, #tpu.memory_space<vmem>>, vector<8x16xf32>
    %c0_1 = arith.constant 0 : index
    %c0_2 = arith.constant 0 : index
    %1 = vector.load %arg3[%c0_1, %c0_2] : memref<32x16xf32, #tpu.memory_space<vmem>>, vector<32x16xf32>
    %cst = arith.constant dense<0.000000e+00> : vector<32x8xf32>
    %2 = tpu.matmul %1, %0, %cst {dimension_numbers = #tpu.dot_dimension_numbers<[1], [1], [0], [0], [0, 0, 1, 0], [], []>} : vector<32x16xf32>, vector<8x16xf32>, vector<32x8xf32> -> vector<32x8xf32>
    %c0_3 = arith.constant 0 : index
    %c0_4 = arith.constant 0 : index
    %3 = vector.load %arg4[%c0_3, %c0_4] : memref<32x1xf32, #tpu.memory_space<vmem>>, vector<32x1xf32>
    %4 = vector.broadcast %3 : vector<32x1xf32> to vector<32x8xf32>
    %5 = arith.addf %2, %4 : vector<32x8xf32>
    %cst_5 = arith.constant 0.000000e+00 : f32
    %6 = vector.broadcast %cst_5 : f32 to vector<32x8xf32>
    %7 = arith.maximumf %5, %6 : vector<32x8xf32>
    %c0_6 = arith.constant 0 : index
    %c0_7 = arith.constant 0 : index
    %8 = vector.load %arg5[%c0_6, %c0_7] : memref<32x1xf32, #tpu.memory_space<vmem>>, vector<32x1xf32>
    %c0_8 = arith.constant 0 : index
    %c0_9 = arith.constant 0 : index
    %9 = vector.load %arg6[%c0_8, %c0_9] : memref<32x1xf32, #tpu.memory_space<vmem>>, vector<32x1xf32>
    %cst_10 = arith.constant dense<0.000000e+00> : vector<8xf32>
    %10 = vector.multi_reduction <add>, %7, %cst_10 [0] : vector<32x8xf32> to vector<8xf32>
    %11 = vector.shape_cast %10 : vector<8xf32> to vector<1x8xf32>
    %cst_11 = arith.constant 3.200000e+01 : f32
    %12 = vector.broadcast %cst_11 : f32 to vector<1x8xf32>
    %13 = arith.divf %11, %12 : vector<1x8xf32>
    %14 = vector.broadcast %13 : vector<1x8xf32> to vector<32x8xf32>
    %15 = arith.subf %7, %14 : vector<32x8xf32>
    %16 = vector.broadcast %13 : vector<1x8xf32> to vector<32x8xf32>
    %17 = arith.subf %7, %16 : vector<32x8xf32>
    %18 = arith.mulf %15, %17 : vector<32x8xf32>
    %cst_12 = arith.constant dense<0.000000e+00> : vector<8xf32>
    %19 = vector.multi_reduction <add>, %18, %cst_12 [0] : vector<32x8xf32> to vector<8xf32>
    %20 = vector.shape_cast %19 : vector<8xf32> to vector<1x8xf32>
    %cst_13 = arith.constant 3.200000e+01 : f32
    %21 = vector.broadcast %cst_13 : f32 to vector<1x8xf32>
    %22 = arith.divf %20, %21 : vector<1x8xf32>
    %23 = vector.broadcast %13 : vector<1x8xf32> to vector<32x8xf32>
    %24 = arith.subf %7, %23 : vector<32x8xf32>
    %cst_14 = arith.constant 9.99999974E-6 : f32
    %25 = vector.broadcast %cst_14 : f32 to vector<1x8xf32>
    %26 = arith.addf %22, %25 : vector<1x8xf32>
    %27 = math.rsqrt %26 : vector<1x8xf32>
    %28 = vector.broadcast %27 : vector<1x8xf32> to vector<32x8xf32>
    %29 = arith.mulf %24, %28 : vector<32x8xf32>
    %30 = vector.broadcast %8 : vector<32x1xf32> to vector<32x8xf32>
    %31 = arith.mulf %29, %30 : vector<32x8xf32>
    %32 = vector.broadcast %9 : vector<32x1xf32> to vector<32x8xf32>
    %33 = arith.addf %31, %32 : vector<32x8xf32>
    %c0_15 = arith.constant 0 : index
    %c0_16 = arith.constant 0 : index
    %34 = vector.load %arg7[%c0_15, %c0_16] : memref<16x32xf32, #tpu.memory_space<vmem>>, vector<16x32xf32>
    %cst_17 = arith.constant dense<0.000000e+00> : vector<16x8xf32>
    %35 = tpu.matmul %34, %33, %cst_17 {dimension_numbers = #tpu.dot_dimension_numbers<[1], [0], [0], [1], [0, 0, 1, 1], [], []>} : vector<16x32xf32>, vector<32x8xf32>, vector<16x8xf32> -> vector<16x8xf32>
    %c0_18 = arith.constant 0 : index
    %c0_19 = arith.constant 0 : index
    %36 = vector.load %arg8[%c0_18, %c0_19] : memref<16x1xf32, #tpu.memory_space<vmem>>, vector<16x1xf32>
    %37 = vector.broadcast %36 : vector<16x1xf32> to vector<16x8xf32>
    %38 = arith.addf %35, %37 : vector<16x8xf32>
    %cst_20 = arith.constant 0.000000e+00 : f32
    %39 = vector.broadcast %cst_20 : f32 to vector<16x8xf32>
    %40 = arith.maximumf %38, %39 : vector<16x8xf32>
    %c0_21 = arith.constant 0 : index
    %c0_22 = arith.constant 0 : index
    %41 = vector.load %arg9[%c0_21, %c0_22] : memref<16x1xf32, #tpu.memory_space<vmem>>, vector<16x1xf32>
    %c0_23 = arith.constant 0 : index
    %c0_24 = arith.constant 0 : index
    %42 = vector.load %arg10[%c0_23, %c0_24] : memref<16x1xf32, #tpu.memory_space<vmem>>, vector<16x1xf32>
    %cst_25 = arith.constant dense<0.000000e+00> : vector<8xf32>
    %43 = vector.multi_reduction <add>, %40, %cst_25 [0] : vector<16x8xf32> to vector<8xf32>
    %44 = vector.shape_cast %43 : vector<8xf32> to vector<1x8xf32>
    %cst_26 = arith.constant 1.600000e+01 : f32
    %45 = vector.broadcast %cst_26 : f32 to vector<1x8xf32>
    %46 = arith.divf %44, %45 : vector<1x8xf32>
    %47 = vector.broadcast %46 : vector<1x8xf32> to vector<16x8xf32>
    %48 = arith.subf %40, %47 : vector<16x8xf32>
    %49 = vector.broadcast %46 : vector<1x8xf32> to vector<16x8xf32>
    %50 = arith.subf %40, %49 : vector<16x8xf32>
    %51 = arith.mulf %48, %50 : vector<16x8xf32>
    %cst_27 = arith.constant dense<0.000000e+00> : vector<8xf32>
    %52 = vector.multi_reduction <add>, %51, %cst_27 [0] : vector<16x8xf32> to vector<8xf32>
    %53 = vector.shape_cast %52 : vector<8xf32> to vector<1x8xf32>
    %cst_28 = arith.constant 1.600000e+01 : f32
    %54 = vector.broadcast %cst_28 : f32 to vector<1x8xf32>
    %55 = arith.divf %53, %54 : vector<1x8xf32>
    %56 = vector.broadcast %46 : vector<1x8xf32> to vector<16x8xf32>
    %57 = arith.subf %40, %56 : vector<16x8xf32>
    %cst_29 = arith.constant 9.99999974E-6 : f32
    %58 = vector.broadcast %cst_29 : f32 to vector<1x8xf32>
    %59 = arith.addf %55, %58 : vector<1x8xf32>
    %60 = math.rsqrt %59 : vector<1x8xf32>
    %61 = vector.broadcast %60 : vector<1x8xf32> to vector<16x8xf32>
    %62 = arith.mulf %57, %61 : vector<16x8xf32>
    %63 = vector.broadcast %41 : vector<16x1xf32> to vector<16x8xf32>
    %64 = arith.mulf %62, %63 : vector<16x8xf32>
    %65 = vector.broadcast %42 : vector<16x1xf32> to vector<16x8xf32>
    %66 = arith.addf %64, %65 : vector<16x8xf32>
    %c0_30 = arith.constant 0 : index
    %c0_31 = arith.constant 0 : index
    %67 = vector.load %arg11[%c0_30, %c0_31] : memref<8x16xf32, #tpu.memory_space<vmem>>, vector<8x16xf32>
    %cst_32 = arith.constant dense<0.000000e+00> : vector<8x8xf32>
    %68 = tpu.matmul %67, %66, %cst_32 {dimension_numbers = #tpu.dot_dimension_numbers<[1], [0], [0], [1], [0, 0, 1, 1], [], []>} : vector<8x16xf32>, vector<16x8xf32>, vector<8x8xf32> -> vector<8x8xf32>
    %c0_33 = arith.constant 0 : index
    %c0_34 = arith.constant 0 : index
    %69 = vector.load %arg12[%c0_33, %c0_34] : memref<8x1xf32, #tpu.memory_space<vmem>>, vector<8x1xf32>
    %70 = vector.broadcast %69 : vector<8x1xf32> to vector<8x8xf32>
    %71 = arith.addf %68, %70 : vector<8x8xf32>
    %cst_35 = arith.constant 0.000000e+00 : f32
    %72 = vector.broadcast %cst_35 : f32 to vector<8x8xf32>
    %73 = arith.maximumf %71, %72 : vector<8x8xf32>
    %c0_36 = arith.constant 0 : index
    %c0_37 = arith.constant 0 : index
    %74 = vector.load %arg13[%c0_36, %c0_37] : memref<8x1xf32, #tpu.memory_space<vmem>>, vector<8x1xf32>
    %c0_38 = arith.constant 0 : index
    %c0_39 = arith.constant 0 : index
    %75 = vector.load %arg14[%c0_38, %c0_39] : memref<8x1xf32, #tpu.memory_space<vmem>>, vector<8x1xf32>
    %cst_40 = arith.constant dense<0.000000e+00> : vector<8xf32>
    %76 = vector.multi_reduction <add>, %73, %cst_40 [0] : vector<8x8xf32> to vector<8xf32>
    %77 = vector.shape_cast %76 : vector<8xf32> to vector<1x8xf32>
    %cst_41 = arith.constant 8.000000e+00 : f32
    %78 = vector.broadcast %cst_41 : f32 to vector<1x8xf32>
    %79 = arith.divf %77, %78 : vector<1x8xf32>
    %80 = vector.broadcast %79 : vector<1x8xf32> to vector<8x8xf32>
    %81 = arith.subf %73, %80 : vector<8x8xf32>
    %82 = vector.broadcast %79 : vector<1x8xf32> to vector<8x8xf32>
    %83 = arith.subf %73, %82 : vector<8x8xf32>
    %84 = arith.mulf %81, %83 : vector<8x8xf32>
    %cst_42 = arith.constant dense<0.000000e+00> : vector<8xf32>
    %85 = vector.multi_reduction <add>, %84, %cst_42 [0] : vector<8x8xf32> to vector<8xf32>
    %86 = vector.shape_cast %85 : vector<8xf32> to vector<1x8xf32>
    %cst_43 = arith.constant 8.000000e+00 : f32
    %87 = vector.broadcast %cst_43 : f32 to vector<1x8xf32>
    %88 = arith.divf %86, %87 : vector<1x8xf32>
    %89 = vector.broadcast %79 : vector<1x8xf32> to vector<8x8xf32>
    %90 = arith.subf %73, %89 : vector<8x8xf32>
    %cst_44 = arith.constant 9.99999974E-6 : f32
    %91 = vector.broadcast %cst_44 : f32 to vector<1x8xf32>
    %92 = arith.addf %88, %91 : vector<1x8xf32>
    %93 = math.rsqrt %92 : vector<1x8xf32>
    %94 = vector.broadcast %93 : vector<1x8xf32> to vector<8x8xf32>
    %95 = arith.mulf %90, %94 : vector<8x8xf32>
    %96 = vector.broadcast %74 : vector<8x1xf32> to vector<8x8xf32>
    %97 = arith.mulf %95, %96 : vector<8x8xf32>
    %98 = vector.broadcast %75 : vector<8x1xf32> to vector<8x8xf32>
    %99 = arith.addf %97, %98 : vector<8x8xf32>
    %c0_45 = arith.constant 0 : index
    %c0_46 = arith.constant 0 : index
    %100 = vector.load %arg15[%c0_45, %c0_46] : memref<8x4xf32, #tpu.memory_space<vmem>>, vector<8x4xf32>
    %cst_47 = arith.constant dense<0.000000e+00> : vector<8x4xf32>
    %101 = tpu.matmul %99, %100, %cst_47 {dimension_numbers = #tpu.dot_dimension_numbers<[0], [0], [1], [1], [0, 1, 1, 1], [], []>} : vector<8x8xf32>, vector<8x4xf32>, vector<8x4xf32> -> vector<8x4xf32>
    %c0_48 = arith.constant 0 : index
    %c0_49 = arith.constant 0 : index
    %102 = vector.load %arg16[%c0_48, %c0_49] : memref<1x4xf32, #tpu.memory_space<vmem>>, vector<1x4xf32>
    %103 = vector.broadcast %102 : vector<1x4xf32> to vector<8x4xf32>
    %104 = arith.addf %101, %103 : vector<8x4xf32>
    %105 = arith.negf %104 : vector<8x4xf32>
    %106 = math.exp %105 : vector<8x4xf32>
    %cst_50 = arith.constant 1.000000e+00 : f32
    %107 = vector.broadcast %cst_50 : f32 to vector<8x4xf32>
    %108 = arith.addf %107, %106 : vector<8x4xf32>
    %109 = arith.divf %107, %108 : vector<8x4xf32>
    %c0_51 = arith.constant 0 : index
    %c0_52 = arith.constant 0 : index
    %110 = memref.load %arg1[%c0_51, %c0_52] : memref<1x1xf32, #tpu.memory_space<smem>>
    %111 = vector.broadcast %110 : f32 to vector<8x4xf32>
    %112 = arith.mulf %109, %111 : vector<8x4xf32>
    %c0_53 = arith.constant 0 : index
    %c0_54 = arith.constant 0 : index
    %113 = vector.load %arg17[%c0_53, %c0_54] : memref<8x4xf32, #tpu.memory_space<vmem>>, vector<8x4xf32>
    tpu.vector_store %arg17[%c0_53, %c0_54], %112 {strides = array<i32>} : memref<8x4xf32, #tpu.memory_space<vmem>>, vector<8x4xf32>,
    return
  }
  func.func @transform_0(%arg0: i32) -> (i32, i32) {
    %c0_i32 = arith.constant 0 : i32
    %c0_i32_0 = arith.constant 0 : i32
    %c0_i32_1 = arith.constant 0 : i32
    return %c0_i32, %c0_i32_0 : i32, i32
  }
  func.func @transform_1(%arg0: i32) -> (i32, i32) {
    %c0_i32 = arith.constant 0 : i32
    %c0_i32_0 = arith.constant 0 : i32
    return %arg0, %c0_i32 : i32, i32
  }
  func.func @transform_2(%arg0: i32) -> (i32, i32) {
    %c0_i32 = arith.constant 0 : i32
    %c0_i32_0 = arith.constant 0 : i32
    %c0_i32_1 = arith.constant 0 : i32
    return %c0_i32, %c0_i32_0 : i32, i32
  }
  func.func @transform_3(%arg0: i32) -> (i32, i32) {
    %c0_i32 = arith.constant 0 : i32
    %c0_i32_0 = arith.constant 0 : i32
    %c0_i32_1 = arith.constant 0 : i32
    return %c0_i32, %c0_i32_0 : i32, i32
  }
  func.func @transform_4(%arg0: i32) -> (i32, i32) {
    %c0_i32 = arith.constant 0 : i32
    %c0_i32_0 = arith.constant 0 : i32
    %c0_i32_1 = arith.constant 0 : i32
    return %c0_i32, %c0_i32_0 : i32, i32
  }
  func.func @transform_5(%arg0: i32) -> (i32, i32) {
    %c0_i32 = arith.constant 0 : i32
    %c0_i32_0 = arith.constant 0 : i32
    %c0_i32_1 = arith.constant 0 : i32
    return %c0_i32, %c0_i32_0 : i32, i32
  }
  func.func @transform_6(%arg0: i32) -> (i32, i32) {
    %c0_i32 = arith.constant 0 : i32
    %c0_i32_0 = arith.constant 0 : i32
    %c0_i32_1 = arith.constant 0 : i32
    return %c0_i32, %c0_i32_0 : i32, i32
  }
  func.func @transform_7(%arg0: i32) -> (i32, i32) {
    %c0_i32 = arith.constant 0 : i32
    %c0_i32_0 = arith.constant 0 : i32
    %c0_i32_1 = arith.constant 0 : i32
    return %c0_i32, %c0_i32_0 : i32, i32
  }
  func.func @transform_8(%arg0: i32) -> (i32, i32) {
    %c0_i32 = arith.constant 0 : i32
    %c0_i32_0 = arith.constant 0 : i32
    %c0_i32_1 = arith.constant 0 : i32
    return %c0_i32, %c0_i32_0 : i32, i32
  }
  func.func @transform_9(%arg0: i32) -> (i32, i32) {
    %c0_i32 = arith.constant 0 : i32
    %c0_i32_0 = arith.constant 0 : i32
    %c0_i32_1 = arith.constant 0 : i32
    return %c0_i32, %c0_i32_0 : i32, i32
  }
  func.func @transform_10(%arg0: i32) -> (i32, i32) {
    %c0_i32 = arith.constant 0 : i32
    %c0_i32_0 = arith.constant 0 : i32
    %c0_i32_1 = arith.constant 0 : i32
    return %c0_i32, %c0_i32_0 : i32, i32
  }
  func.func @transform_11(%arg0: i32) -> (i32, i32) {
    %c0_i32 = arith.constant 0 : i32
    %c0_i32_0 = arith.constant 0 : i32
    %c0_i32_1 = arith.constant 0 : i32
    return %c0_i32, %c0_i32_0 : i32, i32
  }
  func.func @transform_12(%arg0: i32) -> (i32, i32) {
    %c0_i32 = arith.constant 0 : i32
    %c0_i32_0 = arith.constant 0 : i32
    %c0_i32_1 = arith.constant 0 : i32
    return %c0_i32, %c0_i32_0 : i32, i32
  }
  func.func @transform_13(%arg0: i32) -> (i32, i32) {
    %c0_i32 = arith.constant 0 : i32
    %c0_i32_0 = arith.constant 0 : i32
    %c0_i32_1 = arith.constant 0 : i32
    return %c0_i32, %c0_i32_0 : i32, i32
  }
  func.func @transform_14(%arg0: i32) -> (i32, i32) {
    %c0_i32 = arith.constant 0 : i32
    %c0_i32_0 = arith.constant 0 : i32
    %c0_i32_1 = arith.constant 0 : i32
    return %c0_i32, %c0_i32_0 : i32, i32
  }
  func.func @transform_15(%arg0: i32) -> (i32, i32) {
    %c0_i32 = arith.constant 0 : i32
    %c0_i32_0 = arith.constant 0 : i32
    %c0_i32_1 = arith.constant 0 : i32
    return %c0_i32, %c0_i32_0 : i32, i32
  }
  func.func @transform_16(%arg0: i32) -> (i32, i32) {
    %c0_i32 = arith.constant 0 : i32
    %c0_i32_0 = arith.constant 0 : i32
    return %arg0, %c0_i32 : i32, i32
  }
}

</mosaic_0001>

<bundles_post_ra>
// kernel: tpu_custom_call.1
= control target key start
LH: loop header
LB: loop body
LE: loop exit
PB: predicated region body
PF: predicated region fallthrough
CT: control target
= control target key end

     0   :  { %vm83_vm0 = vcmask 130048   ;;  %v761_v2 = vmov 0   ;;  %vm302_vm1 = vcmask 261120   ;;  %vm196_vm2 = vcmask 64512   ;;  %s972_s1 = inlined_call_operand.vmem [shape: f32[8,16], index: 1, kind: input, shape index: {}]   ;;  %s973_s2 = inlined_call_operand.vmem [shape: f32[32,16], index: 2, kind: input, shape index: {}]   ;;  %s974_s3 = inlined_call_operand.vmem [shape: f32[32,1], index: 3, kind: input, shape index: {}]   ;;  %s975_s4 = inlined_call_operand.vmem [shape: f32[32,1], index: 4, kind: input, shape index: {}]   ;;  %s976_s5 = inlined_call_operand.vmem [shape: f32[32,1], index: 5, kind: input, shape index: {}]   ;;  %s977_s7 = inlined_call_operand.vmem [shape: f32[16,1], index: 7, kind: input, shape index: {}]   ;;  %s978_s8 = inlined_call_operand.vmem [shape: f32[16,1], index: 8, kind: input, shape index: {}]   ;;  %s979_s9 = inlined_call_operand.vmem [shape: f32[16,1], index: 9, kind: input, shape index: {}]   ;;  %s980_s11 = inlined_call_operand.vmem [shape: f32[8,1], index: 11, kind: input, shape index: {}]   ;;  %s981_s12 = inlined_call_operand.vmem [shape: f32[8,1], index: 12, kind: input, shape index: {}]   ;;  %s982_s13 = inlined_call_operand.vmem [shape: f32[8,1], index: 13, kind: input, shape index: {}]   ;;  %s983_s6 = inlined_call_operand.vmem [shape: f32[16,32], index: 6, kind: input, shape index: {}]   ;;  %s984_s10 = inlined_call_operand.vmem [shape: f32[8,16], index: 10, kind: input, shape index: {}]   ;;  %s985_s14 = inlined_call_operand.vmem [shape: f32[8,4], index: 14, kind: input, shape index: {}]   ;;  %s986_s15 = inlined_call_operand.vmem [shape: f32[1,4], index: 15, kind: input, shape index: {}]   ;;  %s987_s0 = inlined_call_operand.<no memory space> [shape: f32[1,1], index: 0, kind: input, shape index: {}]   ;;  %s988_s16 = inlined_call_operand.vmem [shape: f32[8,4], index: 16, kind: output, shape index: {}]  }
   0x1   :  { %989 = sst [smem:[#allocation3_spill]] %s972_s1  ;;  %v55_v1 = vld [vmem:[%s973_s2] sm:$0xff]  ;;  %749 = vset.pattern.permute.xlu0 %v761_v2  ;;  %750 = vset.pattern.permute.xlu1 %v761_v2  ;;  %v56_v4 = vld [vmem:[%s973_s2 + $0x8] sm:$0xff]  ;;  %v61_v5 = vld [vmem:[%s974_s3 + $0x10] sm:$0xff]  ;;  %vm763_vm3 = vmmov 0   ;;  %vm682_vm4 = vcmask 31744  }
   0x2   :  { %s990_s23 = sld [smem:[#allocation3_spill]]  ;;  %717 = vmatprep.mubr.msk.f32.mxu0 %vm83_vm0, %v55_v1  ;;  %v59_v3 = vld [vmem:[%s974_s3] sm:$0xff]  ;;  %v57_v6 = vld [vmem:[%s973_s2 + $0x10] sm:$0xff]  ;;  %v60_v7 = vld [vmem:[%s974_s3 + $0x8] sm:$0xff]  ;;  %75 = vperm.xlu1 %750, %v61_v5  }
   0x3   :  { %65 = vperm.xlu0 %749, %v59_v3   ;;  %v62_v8 = vld [vmem:[%s974_s3 + $0x18] sm:$0xff]  ;;  %v190_v11 = vld [vmem:[%s975_s4 + $0x10] sm:$0xff]  ;;  %v189_v13 = vld [vmem:[%s975_s4 + $0x8] sm:$0xff] }
   0x4   :  { %v58_v9 = vld [vmem:[%s973_s2 + $0x18] sm:$0xff]  ;;  %v194_v14 = vld [vmem:[%s976_s5 + $0x10] sm:$0xff]  ;;  %v188_v15 = vld [vmem:[%s975_s4] sm:$0xff] }
   0x5   :  { %v191_v10 = vld [vmem:[%s975_s4 + $0x18] sm:$0xff]  ;;  %v193_v16 = vld [vmem:[%s976_s5 + $0x8] sm:$0xff]  ;;  %v192_v17 = vld [vmem:[%s976_s5] sm:$0xff] }
   0x6   :  { %80 = vperm.xlu1 %750, %v62_v8   ;;  %v195_v12 = vld [vmem:[%s976_s5 + $0x18] sm:$0xff]  ;;  %v290_v18 = vld [vmem:[%s977_s7] sm:$0xff]  ;;  %v291_v19 = vld [vmem:[%s977_s7 + $0x8] sm:$0xff] }
   0x7   :  { %70 = vperm.xlu0 %749, %v60_v7   ;;  %v387_v20 = vld [vmem:[%s978_s8 + $0x8] sm:$0xff]  ;;  %v386_v21 = vld [vmem:[%s978_s8] sm:$0xff] }
   0x8   :  { %v54_v0 = vld [vmem:[%s990_s23] sm:$0xff]  ;;  %v389_v22 = vld [vmem:[%s979_s9 + $0x8] sm:$0xff] }
   0x9   :  { %715 = vmatprep.subr.msk.mxu0 %vm83_vm0, %v54_v0  ;;  %v388_v23 = vld [vmem:[%s979_s9] sm:$0xff] }
   0xa   :  { %716 = vmatpush3.xpose.msk.msra.mxu0 %vm83_vm0, %v54_v0  ;;  %252 = vperm.xlu1 %750, %v190_v11   ;;  %v444_v24 = vld [vmem:[%s980_s11] sm:$0xff] }
   0xb   :  { %257 = vperm.xlu0 %749, %v191_v10   ;;  %v524_v25 = vld [vmem:[%s981_s12] sm:$0xff] }
   0xc   :  { %v525_v26 = vld [vmem:[%s982_s13] sm:$0xff] }
   0xd   :  { %718 = vmatmul.mubr.msk.f32.vlgmr.msra.gmra.mxu0 %vm83_vm0, %v56_v4  ;;  %v288_v27 = vld [vmem:[%s983_s6] sm:$0xff] }
   0xe   :  { %720 = vmatprep.mubr.msk.f32.mxu0 %vm83_vm0, %v57_v6  ;;  %247 = vperm.xlu1 %750, %v189_v13  }
   0xf   :  { %281 = vperm.xlu0 %749, %v195_v12   ;;  %731 = vmatprep.mubr.msk.f32.mxu1 %vm302_vm1, %v288_v27 }
  0x11   :  { %721 = vmatmul.mubr.msk.f32.gmra.mxu0 %vm83_vm0, %v58_v9 }
  0x12   :  { %242 = vperm.xlu1 %750, %v188_v15  }
  0x13   :  { %276 = vperm.xlu0 %749, %v194_v14  }
  0x16   :  { %266 = vperm.xlu1 %750, %v192_v17  }
  0x17   :  { %271 = vperm.xlu0 %749, %v193_v16  }
  0x1a   :  { %299 = vperm.xlu1 %750, %v291_v19  }
  0x1b   :  { %294 = vperm.xlu0 %749, %v290_v18  }
  0x1e   :  { %421 = vperm.xlu1 %750, %v386_v21  }
  0x1f   :  { %426 = vperm.xlu0 %749, %v387_v20  }
  0x22   :  { %433 = vperm.xlu1 %750, %v388_v23  }
  0x23   :  { %438 = vperm.xlu0 %749, %v389_v22  }
  0x26   :  { %550 = vperm.xlu1 %750, %v524_v25  }
  0x27   :  { %447 = vperm.xlu0 %749, %v444_v24  }
  0x2b   :  { %556 = vperm.xlu0 %749, %v525_v26  }
  0x7d   :  { %v76_v29 = vpop.permute.xlu1 %75 }
  0x7e   :  { %v66_v28 = vpop.permute.xlu0 %65 }
  0x81   :  { %v81_v35 = vpop.permute.xlu1 %80 }
  0x82   :  { %v71_v30 = vpop.permute.xlu0 %70 }
  0x85   :  { %v253_v18 = vpop.permute.xlu1 %252 }
  0x86   :  { %v258_v17 = vpop.permute.xlu0 %257 }
  0x89   :  { %v248_v20 = vpop.permute.xlu1 %247 }
  0x8a   :  { %v282_v19 = vpop.permute.xlu0 %281 }
  0x8e   :  { %v277_v25 = vpop.permute.xlu0 %276 }
  0xcd   :  { %v719_v31 = vpop.f32.mrf.mxu0 }
  0xce   :  { %v171_v32 = vadd.f32 %v719_v31, %v71_v30 }
  0xcf   :  { %v165_v33 = vpop.f32.mrf.mxu0 }
  0xd0   :  { %v166_v34 = vadd.f32 %v165_v33, %v66_v28  ;;  %v185_v37 = vmax.f32 %v171_v32, 0.0 }
  0xd1   :  { %v722_v36 = vpop.f32.mrf.mxu0 }
  0xd2   :  { %v184_v38 = vmax.f32 %v166_v34, 0.0  ;;  %v181_v39 = vadd.f32 %v722_v36, %v81_v35  ;;  %v198_v43 = vsel %vm196_vm2, %v185_v37, 0.0  ;;  %v272_v34 = vpop.permute.xlu0 %271 }
  0xd3   :  { %v175_v40 = vpop.f32.mrf.mxu0 }
  0xd4   :  { %v197_v41 = vsel %vm196_vm2, %v184_v38, 0.0  ;;  %v176_v42 = vadd.f32 %v175_v40, %v76_v29  ;;  %v187_v44 = vmax.f32 %v181_v39, 0.0  ;;  %v243_v29 = vpop.permute.xlu1 %242  ;;  %v762_v39 = vmov 0.0  }
  0xd5   :  { %v199_v46 = vadd.f32 %v198_v43, %v197_v41  ;;  %734 = vmatprep.subr.mxu0 %v762_v39  ;;  %738 = vmatprep.mubr.msk.f32.mxu0 %vm763_vm3, %v762_v39 }
  0xd6   :  { %v186_v45 = vmax.f32 %v176_v42, 0.0  ;;  %v202_v49 = vsel %vm196_vm2, %v187_v44, 0.0  ;;  %v295_v43 = vpop.permute.xlu0 %294 }
  0xd8   :  { %v200_v47 = vsel %vm196_vm2, %v186_v45, 0.0  ;;  %v267_v36 = vpop.permute.xlu1 %266 }
  0xd9   :  { %v201_v48 = vadd.f32 %v200_v47, %v199_v46 }
  0xdb   :  { %v203_v50 = vadd.f32 %v202_v49, %v201_v48 }
  0xdc   :  { %v300_v40 = vpop.permute.xlu1 %299 }
  0xdd   :  { %v204_v51 = vrot.slane %v203_v50, 4 }
  0xdf   :  { %v205_v52 = vadd.f32 %v204_v51, %v203_v50 }
  0xe1   :  { %v206_v53 = vrot.slane %v205_v52, 2 }
  0xe3   :  { %v207_v54 = vadd.f32 %v206_v53, %v205_v52 }
  0xe5   :  { %v208_v55 = vrot.slane %v207_v54, 1 }
  0xe7   :  { %v209_v56 = vadd.f32 %v208_v55, %v207_v54 }
  0xe9   :  { %v211_v57 = vmul.f32 0.03125, %v209_v56 }
  0xeb   :  { %v212_v58 = vsub.f32 %v184_v38, %v211_v57  ;;  %v213_v59 = vsub.f32 %v185_v37, %v211_v57  ;;  %v214_v60 = vsub.f32 %v186_v45, %v211_v57  ;;  %v215_v61 = vsub.f32 %v187_v44, %v211_v57  ;;  %v289_v38 = vld [vmem:[%s983_s6 + $0x8] sm:$0xff] }
  0xed   :  { %v216_v62 = vmul.f32 %v212_v58, %v212_v58  ;;  %v217_v63 = vmul.f32 %v213_v59, %v213_v59  ;;  %v218_v0 = vmul.f32 %v214_v60, %v214_v60  ;;  %v219_v1 = vmul.f32 %v215_v61, %v215_v61 }
  0xef   :  { %v220_v2 = vsel %vm196_vm2, %v216_v62, 0.0  ;;  %v221_v3 = vsel %vm196_vm2, %v217_v63, 0.0  ;;  %v223_v5 = vsel %vm196_vm2, %v218_v0, 0.0  ;;  %v225_v7 = vsel %vm196_vm2, %v219_v1, 0.0 }
  0xf0   :  { %v222_v4 = vadd.f32 %v221_v3, %v220_v2 }
  0xf2   :  { %v224_v6 = vadd.f32 %v223_v5, %v222_v4 }
  0xf4   :  { %v226_v8 = vadd.f32 %v225_v7, %v224_v6 }
  0xf6   :  { %v227_v9 = vrot.slane %v226_v8, 4 }
  0xf8   :  { %v228_v10 = vadd.f32 %v227_v9, %v226_v8  ;;  %v427_v9 = vpop.permute.xlu0 %426 }
  0xfa   :  { %v229_v11 = vrot.slane %v228_v10, 2 }
  0xfc   :  { %v230_v12 = vadd.f32 %v229_v11, %v228_v10  ;;  %v422_v11 = vpop.permute.xlu1 %421 }
  0xfe   :  { %v231_v13 = vrot.slane %v230_v12, 1 }
 0x100   :  { %v232_v14 = vadd.f32 %v231_v13, %v230_v12 }
 0x102   :  { %v233_v15 = vmul.f32 0.03125, %v232_v14 }
 0x104   :  { %v234_v16 = vadd.f32 1e-05, %v233_v15 }
 0x106   :  { %751 = vrsqrt.f32 %v234_v16  ;;  %v439_v16 = vpop.permute.xlu0 %438 }
 0x113   :  { %v752_v21 = vpop.eup %751 }
 0x114   :  { %v238_v22 = vmul.f32 %v752_v21, %v214_v60  ;;  %v239_v23 = vmul.f32 %v752_v21, %v215_v61  ;;  %v237_v24 = vmul.f32 %v752_v21, %v213_v59  ;;  %v236_v28 = vmul.f32 %v752_v21, %v212_v58  ;;  %v560_v21 = vld [vmem:[%s985_s14] sm:$0xff] }
 0x116   :  { %v263_v26 = vmul.f32 %v258_v17, %v239_v23  ;;  %v262_v27 = vmul.f32 %v253_v18, %v238_v22  ;;  %v261_v31 = vmul.f32 %v248_v20, %v237_v24  ;;  %v260_v33 = vmul.f32 %v243_v29, %v236_v28  ;;  %v434_v18 = vpop.permute.xlu1 %433  ;;  %v443_v20 = vld [vmem:[%s984_s10] sm:$0xff]  ;;  %v448_v22 = vpop.permute.xlu0 %447 }
 0x118   :  { %v287_v30 = vadd.f32 %v282_v19, %v263_v26  ;;  %v286_v32 = vadd.f32 %v277_v25, %v262_v27  ;;  %v285_v35 = vadd.f32 %v272_v34, %v261_v31  ;;  %v284_v37 = vadd.f32 %v267_v36, %v260_v33 }
 0x11a   :  { %723 = vmatprep.subr.mxu1 %v287_v30 }
 0x11b   :  { %724 = vmatpush3.msra.mxu1 %v287_v30 }
 0x11c   :  { %725 = vmatprep.subr.mxu1 %v286_v32 }
 0x11d   :  { %726 = vmatpush3.msra.mxu1 %v286_v32 }
 0x11e   :  { %727 = vmatprep.subr.mxu1 %v285_v35 }
 0x11f   :  { %728 = vmatpush3.msra.mxu1 %v285_v35 }
 0x120   :  { %729 = vmatprep.subr.mxu1 %v284_v37 }
 0x121   :  { %730 = vmatpush3.msra.mxu1 %v284_v37 }
 0x122   :  { %732 = vmatmul.mubr.msk.f32.vlgmr.msra.gmra.mxu1 %vm302_vm1, %v289_v38  ;;  %741 = vmatprep.subr.mxu1 %v762_v39 }
 0x123   :  { %743 = vmatprep.mubr.msk.f32.mxu1 %vm763_vm3, %v762_v39  ;;  %742 = vmatpush3.msra.mxu1 %v560_v21 }
 0x1e2   :  { %v733_v41 = vpop.f32.mrf.mxu1 }
 0x1e3   :  { %v381_v42 = vadd.f32 %v733_v41, %v300_v40 }
 0x1e4   :  { %v375_v44 = vpop.f32.mrf.mxu1 }
 0x1e5   :  { %v385_v45 = vmax.f32 %v381_v42, 0.0  ;;  %v376_v46 = vadd.f32 %v375_v44, %v295_v43 }
 0x1e7   :  { %v384_v47 = vmax.f32 %v376_v46, 0.0  ;;  %v391_v48 = vsel %vm196_vm2, %v385_v45, 0.0 }
 0x1e9   :  { %v390_v49 = vsel %vm196_vm2, %v384_v47, 0.0 }
 0x1ea   :  { %v392_v50 = vadd.f32 %v391_v48, %v390_v49  ;;  %v551_v48 = vpop.permute.xlu1 %550 }
 0x1ec   :  { %v393_v51 = vrot.slane %v392_v50, 4 }
 0x1ee   :  { %v394_v52 = vadd.f32 %v393_v51, %v392_v50  ;;  %v557_v50 = vpop.permute.xlu0 %556 }
 0x1f0   :  { %v395_v53 = vrot.slane %v394_v52, 2 }
 0x1f2   :  { %v396_v54 = vadd.f32 %v395_v53, %v394_v52  ;;  %v696_v53 = vld [vmem:[%s986_s15] ss:$0 sm:$0xff] }
 0x1f4   :  { %v397_v55 = vrot.slane %v396_v54, 1 }
 0x1f6   :  { %v398_v56 = vadd.f32 %v397_v55, %v396_v54 }
 0x1f8   :  { %v400_v57 = vmul.f32 0.0625, %v398_v56 }
 0x1fa   :  { %v401_v58 = vsub.f32 %v384_v47, %v400_v57  ;;  %v402_v59 = vsub.f32 %v385_v45, %v400_v57 }
 0x1fc   :  { %v403_v60 = vmul.f32 %v401_v58, %v401_v58  ;;  %v404_v61 = vmul.f32 %v402_v59, %v402_v59 }
 0x1fe   :  { %v405_v62 = vsel %vm196_vm2, %v403_v60, 0.0  ;;  %v406_v63 = vsel %vm196_vm2, %v404_v61, 0.0  ;;  %v680_v60 = vstv %s987_s0 }
 0x1ff   :  { %v407_v0 = vadd.f32 %v406_v63, %v405_v62 }
 0x201   :  { %v408_v1 = vrot.slane %v407_v0, 4 }
 0x203   :  { %v409_v2 = vadd.f32 %v408_v1, %v407_v0 }
 0x205   :  { %v410_v3 = vrot.slane %v409_v2, 2 }
 0x207   :  { %v411_v4 = vadd.f32 %v410_v3, %v409_v2 }
 0x209   :  { %v412_v5 = vrot.slane %v411_v4, 1 }
 0x20b   :  { %v413_v6 = vadd.f32 %v412_v5, %v411_v4 }
 0x20d   :  { %v414_v7 = vmul.f32 0.0625, %v413_v6 }
 0x20f   :  { %v415_v8 = vadd.f32 1e-05, %v414_v7 }
 0x211   :  { %753 = vrsqrt.f32 %v415_v8 }
 0x21e   :  { %v754_v10 = vpop.eup %753 }
 0x21f   :  { %v417_v12 = vmul.f32 %v754_v10, %v401_v58  ;;  %v418_v13 = vmul.f32 %v754_v10, %v402_v59 }
 0x221   :  { %v429_v14 = vmul.f32 %v422_v11, %v417_v12  ;;  %v430_v15 = vmul.f32 %v427_v9, %v418_v13 }
 0x223   :  { %v442_v17 = vadd.f32 %v439_v16, %v430_v15  ;;  %v441_v19 = vadd.f32 %v434_v18, %v429_v14 }
 0x225   :  { %735 = vmatpush3.msra.mxu0 %v442_v17 }
 0x226   :  { %736 = vmatprep.subr.mxu0 %v762_v39 }
 0x227   :  { %737 = vmatpush3.msra.mxu0 %v441_v19 }
 0x228   :  { %739 = vmatmul.mubr.msk.f32.vlgmr.msra.gmra.mxu0 %vm83_vm0, %v443_v20 }
 0x2e8   :  { %v519_v23 = vpop.f32.mrf.mxu0 }
 0x2e9   :  { %v520_v24 = vadd.f32 %v519_v23, %v448_v22 }
 0x2ea   :  { %v740_v25 = vpop.f32.mrf.mxu0 }
 0x2eb   :  { %v523_v26 = vmax.f32 %v520_v24, 0.0 }
 0x2ed   :  { %v526_v27 = vsel %vm196_vm2, %v523_v26, 0.0 }
 0x2ee   :  { %v527_v28 = vrot.slane %v526_v27, 4 }
 0x2f0   :  { %v528_v29 = vadd.f32 %v527_v28, %v526_v27 }
 0x2f2   :  { %v529_v30 = vrot.slane %v528_v29, 2 }
 0x2f4   :  { %v530_v31 = vadd.f32 %v529_v30, %v528_v29 }
 0x2f6   :  { %v531_v32 = vrot.slane %v530_v31, 1 }
 0x2f8   :  { %v532_v33 = vadd.f32 %v531_v32, %v530_v31 }
 0x2fa   :  { %v534_v34 = vmul.f32 0.125, %v532_v33 }
 0x2fc   :  { %v535_v35 = vsub.f32 %v523_v26, %v534_v34 }
 0x2fe   :  { %v536_v36 = vmul.f32 %v535_v35, %v535_v35 }
 0x300   :  { %v537_v37 = vsel %vm196_vm2, %v536_v36, 0.0 }
 0x301   :  { %v538_v38 = vrot.slane %v537_v37, 4 }
 0x303   :  { %v539_v39 = vadd.f32 %v538_v38, %v537_v37 }
 0x305   :  { %v540_v40 = vrot.slane %v539_v39, 2 }
 0x307   :  { %v541_v41 = vadd.f32 %v540_v40, %v539_v39 }
 0x309   :  { %v542_v42 = vrot.slane %v541_v41, 1 }
 0x30b   :  { %v543_v43 = vadd.f32 %v542_v42, %v541_v41 }
 0x30d   :  { %v544_v44 = vmul.f32 0.125, %v543_v43 }
 0x30f   :  { %v545_v45 = vadd.f32 1e-05, %v544_v44 }
 0x311   :  { %755 = vrsqrt.f32 %v545_v45 }
 0x31e   :  { %v756_v46 = vpop.eup %755 }
 0x31f   :  { %v547_v47 = vmul.f32 %v756_v46, %v535_v35 }
 0x321   :  { %v553_v49 = vmul.f32 %v551_v48, %v547_v47 }
 0x323   :  { %v559_v51 = vadd.f32 %v557_v50, %v553_v49 }
 0x325   :  { %568 = vxpose.xlu1.b32.start.end [1/1] (short) (narrow) %v559_v51, 8 }
 0x3a1   :  { %v584_v52 = vpop.trf.xlu1 }
 0x3a2   :  { %744 = vmatmul.mubr.msk.f32.vlgmr.msra.gmra.mxu1 %vm196_vm2, %v584_v52 }
 0x462   :  { %v669_v54 = vpop.f32.mrf.mxu1 }
 0x463   :  { %v670_v55 = vadd.f32 %v696_v53, %v669_v54 }
 0x464   :  { %v745_v56 = vpop.f32.mrf.mxu1 }
 0x465   :  { %v698_v57 = vmul.f32 -1.442695, %v670_v55 }
 0x467   :  { %757 = vpow2.f32 %v698_v57 }
 0x474   :  { %v758_v58 = vpop.eup %757 }
 0x475   :  { %v676_v59 = vadd.f32 1.0, %v758_v58 }
 0x477   :  { %759 = vrcp.f32 %v676_v59 }
 0x484   :  { %v760_v61 = vpop.eup %759 }
 0x485   :  { %v681_v62 = vmul.f32 %v760_v61, %v680_v60 }
 0x487   :  { %683 = vst.msk [vmem:[%s988_s16] sm:$0xff] %vm682_vm4, %v681_v62 }

</bundles_post_ra>
